<compile_context>
chip_gen: v7x
topology: tpu7x:2x2x1
jax: 0.10.0
libtpu: 0.0.40
codegen_flags: <defaults>
</compile_context>

<pallas_src>
import functools

import jax
import jax.numpy as jnp
from jax import lax
from jax.experimental import pallas as pl
from jax.experimental.pallas import tpu as pltpu


def _round_up(x, m):
    return (x + m - 1) // m * m


def _device_kind():
    try:
        return jax.devices()[0].device_kind.lower()
    except Exception:
        return ""


def _global_mhra_kernel(x_hbm, g_ref, bln_ref, wqkv_ref, wout_ref, bout_ref,
                        o_ref, qkv_ref, hout_ref, xbuf_ref, dma_sem, *,
                        heads, dim_head, eps, n_true, n_pad, tq, tk, cw,
                        use_bf16_exp):
    # x_hbm:    (b, c, n_pad) f32 in HBM (memory_space=ANY, manually DMA'd)
    # g_ref, bln_ref, bout_ref: (c, 1) f32
    # wqkv_ref: (3*inner, c) bf16, rows [q*scale ; k ; v]
    # wout_ref: (c, inner) bf16
    # o_ref:    (c, tq) f32 (one query tile, lane-dense)
    # qkv_ref:  (3*inner, n_pad) bf16 scratch, channel-major Q|K|V
    # hout_ref: (inner, tq) bf16 scratch (per-head outputs of this query tile)
    # xbuf_ref: (2, c, cw) f32 scratch (x chunk double buffer)
    # dma_sem:  DMA semaphores (2,)
    inner = heads * dim_head
    nk = n_pad // tk
    nk_full = min(nk, n_true // tk)          # KV chunks fully inside the valid seq
    n_chunks = n_pad // cw
    bi = pl.program_id(0)
    qi = pl.program_id(1)

    # ---------- Phase 1 (once per batch element): LayerNorm + QKV into VMEM ----------
    @pl.when(qi == 0)
    def _():
        gv = g_ref[...]            # (c, 1)
        bv = bln_ref[...]          # (c, 1)
        wqkv = wqkv_ref[...]       # (3*inner, c) bf16

        def start_fetch(ci, slot):
            cs = ci * cw
            if not isinstance(cs, int):
                cs = pl.multiple_of(cs, cw)
            pltpu.make_async_copy(
                x_hbm.at[bi, :, pl.ds(cs, cw)],
                xbuf_ref.at[slot],
                dma_sem.at[slot]).start()

        start_fetch(0, 0)

        def chunk_body(ci, carry):
            slot = lax.rem(ci, 2)
            cs = pl.multiple_of(ci * cw, cw)
            pltpu.make_async_copy(
                x_hbm.at[bi, :, pl.ds(cs, cw)],
                xbuf_ref.at[slot],
                dma_sem.at[slot]).wait()

            @pl.when(ci + 1 < n_chunks)
            def _():
                start_fetch(ci + 1, 1 - slot)

            xc = xbuf_ref[slot]                                        # (c, cw) f32
            mean = jnp.mean(xc, axis=0, keepdims=True)
            diff = xc - mean
            var = jnp.mean(diff * diff, axis=0, keepdims=True)
            # Module LayerNorm: (x - mean) / (std + eps) * g + b, unbiased=False.
            inv = pl.reciprocal(jnp.sqrt(var) + eps, approx=False)     # (1, cw)
            xn = diff * inv * gv + bv
            qkv = jnp.dot(wqkv, xn.astype(jnp.bfloat16),
                          preferred_element_type=jnp.float32)          # (3*inner, cw)
            qkv_ref[:, pl.ds(cs, cw)] = qkv.astype(jnp.bfloat16)
            return carry

        lax.fori_loop(0, n_chunks, chunk_body, 0)

    # ---------- Phase 2: flash attention for this query tile ----------
    q_start = pl.multiple_of(qi * tq, tq)

    def head_body(h, carry):
        hd_q = pl.multiple_of(h * dim_head, dim_head)
        hd_k = pl.multiple_of(inner + h * dim_head, dim_head)
        hd_v = pl.multiple_of(2 * inner + h * dim_head, dim_head)
        q = qkv_ref[pl.ds(hd_q, dim_head), pl.ds(q_start, tq)]         # (d, tq) bf16

        def make_kv_step(masked):
            def kv_step(kv, c3):
                m, l, acc = c3
                ks = kv * tk
                if not isinstance(ks, int):
                    ks = pl.multiple_of(ks, tk)
                k_c = qkv_ref[pl.ds(hd_k, dim_head), pl.ds(ks, tk)]    # (d, tk) bf16
                v_c = qkv_ref[pl.ds(hd_v, dim_head), pl.ds(ks, tk)]    # (d, tk) bf16
                # transposed-LHS MXU matmul: K^T @ Q without a stored transpose
                s = lax.dot_general(k_c, q,
                                    dimension_numbers=(((0,), (0,)), ((), ())),
                                    preferred_element_type=jnp.float32)  # (tk, tq)
                if masked:                                             # tail chunks only
                    rows = lax.broadcasted_iota(jnp.int32, (tk, 1), 0) + ks
                    s = jnp.where(rows < n_true, s, -1e30)
                m_new = jnp.maximum(m, jnp.max(s, axis=0, keepdims=True))   # (1, tq)
                alpha = jnp.exp(m - m_new)                                  # (1, tq)
                if use_bf16_exp:
                    p = jnp.exp((s - m_new).astype(jnp.bfloat16))           # bf16 EUP
                    psum = jnp.sum(p, axis=0, keepdims=True, dtype=jnp.float32)
                else:
                    pf = jnp.exp(s - m_new)                                  # f32 (v5e)
                    psum = jnp.sum(pf, axis=0, keepdims=True)
                    p = pf.astype(jnp.bfloat16)
                l_new = alpha * l + psum
                acc_new = alpha * acc + jnp.dot(v_c, p,
                                                preferred_element_type=jnp.float32)
                return m_new, l_new, acc_new
            return kv_step

        c3 = (jnp.full((1, tq), -1e30, jnp.float32),
              jnp.zeros((1, tq), jnp.float32),
              jnp.zeros((dim_head, tq), jnp.float32))
        if nk_full > 0:   # fully-valid chunks: no masking overhead
            c3 = lax.fori_loop(0, nk_full, make_kv_step(False), c3,
                               unroll=min(nk_full, 8))
        masked_step = make_kv_step(True)
        for kv in range(nk_full, nk):      # peeled tail chunks containing padding
            c3 = masked_step(kv, c3)
        _, l, acc = c3

        inv_l = pl.reciprocal(l, approx=True)                           # (1, tq)
        hout_ref[pl.ds(hd_q, dim_head), :] = (acc * inv_l).astype(jnp.bfloat16)
        return carry

    lax.fori_loop(0, heads, head_body, 0)

    # ---------- Output projection (single wide matmul) + bias, lane-dense store ----------
    o_ref[...] = (jnp.dot(wout_ref[...], hout_ref[...],
                          preferred_element_type=jnp.float32) + bout_ref[...])


def global_mhra(x, params, *, heads, dim_head, eps=1e-5, tq=None, tk=None,
                ln_chunk=None, use_bf16_exp=None, vmem_limit_bytes=None):
    """x: (b, c, t, h, w) float32 (PyTorch NCTHW convention)."""
    b, c, t, hh, w = x.shape
    n = t * hh * w
    inner = heads * dim_head
    scale = dim_head ** (-0.5)
    g, b_ln, w_qkv, w_out, b_out = params

    # --- per-chip knobs: bf16 exp only where the EUP has bf16 (v6e/v7x); VMEM cap
    #     derived from the chip's physical VMEM (128 MiB v5e/v6e, 64 MiB v7x). ---
    dk = _device_kind()
    if use_bf16_exp is None:
        use_bf16_exp = ("v6" in dk) or ("v7" in dk)
    if vmem_limit_bytes is None:
        vmem_limit_bytes = (96 if ("v5" in dk or "v6" in dk) else 48) * 1024 * 1024

    # --- tile sizes: lane-aligned (128 multiples); sequence padded to a multiple of tq ---
    if tq is None:
        tq = min(256, _round_up(n, 128))
    assert tq % 128 == 0
    n_pad = _round_up(n, tq)
    if tk is None:
        tk = min(256, n_pad)              # 256 keeps (tk,tq) f32 score blocks small
        while n_pad % tk:
            tk -= 128
    assert tk % 128 == 0 and n_pad % tk == 0
    if ln_chunk is None:                  # LN/QKV chunk width decoupled from tk
        ln_chunk = min(512, n_pad)
        while n_pad % ln_chunk:
            ln_chunk -= 128
    assert ln_chunk % 128 == 0 and n_pad % ln_chunk == 0
    nq = n_pad // tq

    # --- weight prep: fold attention scale into Q rows; bf16 MXU operands.
    #     Conv1d weights are (out, in, 1); row order stays [q ; k ; v]. ---
    wf = w_qkv[:, :, 0]                                                # (3*inner, c)
    wqkv_r = jnp.concatenate([wf[:inner] * scale, wf[inner:]],
                             axis=0).astype(jnp.bfloat16)
    wout_r = w_out[:, :, 0].astype(jnp.bfloat16)                       # (c, inner)
    g2 = g.reshape(c, 1).astype(jnp.float32)
    bln2 = b_ln.reshape(c, 1).astype(jnp.float32)
    bout2 = b_out.reshape(c, 1).astype(jnp.float32)

    # NCTHW -> channel-major (b, c, n); zero-pad the sequence (no transposes).
    x2 = x.reshape(b, c, n)
    if n_pad != n:
        x2 = jnp.pad(x2, ((0, 0), (0, 0), (0, n_pad - n)))

    kernel = functools.partial(
        _global_mhra_kernel, heads=heads, dim_head=dim_head, eps=eps,
        n_true=n, n_pad=n_pad, tq=tq, tk=tk, cw=ln_chunk,
        use_bf16_exp=use_bf16_exp)

    out = pl.pallas_call(
        kernel,
        out_shape=jax.ShapeDtypeStruct((b, c, n_pad), jnp.float32),
        grid_spec=pltpu.PrefetchScalarGridSpec(
            num_scalar_prefetch=0,
            grid=(b, nq),
            in_specs=[
                pl.BlockSpec(memory_space=pl.ANY),                        # x: stays in HBM
                pl.BlockSpec((c, 1), lambda bi, qi: (0, 0)),              # LN gamma
                pl.BlockSpec((c, 1), lambda bi, qi: (0, 0)),              # LN beta
                pl.BlockSpec((3 * inner, c), lambda bi, qi: (0, 0)),      # wqkv (bf16)
                pl.BlockSpec((c, inner), lambda bi, qi: (0, 0)),          # wout (bf16)
                pl.BlockSpec((c, 1), lambda bi, qi: (0, 0)),              # out bias
            ],
            out_specs=pl.BlockSpec((None, c, tq), lambda bi, qi: (bi, 0, qi)),
            scratch_shapes=[
                pltpu.VMEM((3 * inner, inner and n_pad), jnp.bfloat16),   # Q|K|V channel-major
                pltpu.VMEM((inner, tq), jnp.bfloat16),                    # per-tile head outputs
                pltpu.VMEM((2, c, ln_chunk), jnp.float32),                # x chunk double buffer
                pltpu.SemaphoreType.DMA((2,)),
            ],
        ),
        compiler_params=pltpu.CompilerParams(
            dimension_semantics=("parallel", "arbitrary"),
            vmem_limit_bytes=vmem_limit_bytes,
        ),
    )(x2, g2, bln2, wqkv_r, wout_r, bout2)

    # drop sequence padding, back to NCTHW (pure reshape/slice, no transpose)
    return out[:, :, :n].reshape(b, c, t, hh, w)


def global_mhra_ref(x, params, *, heads, dim_head, eps=1e-5):
    """Pure-JAX reference mirroring the PyTorch forward exactly."""
    g, b_ln, w_qkv, w_out, b_out = params
    b, c, t, hh, w = x.shape
    n = t * hh * w
    inner = heads * dim_head
    scale = dim_head ** (-0.5)

    mean = jnp.mean(x, axis=1, keepdims=True)
    var = jnp.var(x, axis=1, keepdims=True)                      # unbiased=False
    xn = (x - mean) / (jnp.sqrt(var) + eps) * g + b_ln

    xf = xn.reshape(b, c, n)                                     # (b, c, n)
    qkv = jnp.einsum('oc,bcn->bon', w_qkv[:, :, 0], xf)          # (b, 3*inner, n)
    q, k, v = jnp.split(qkv, 3, axis=1)

    def to_heads(tt):
        return jnp.transpose(tt.reshape(b, heads, dim_head, n), (0, 1, 3, 2))
    q, k, v = map(to_heads, (q, k, v))                           # (b, h, n, d)
    q = q * scale
    sim = jnp.einsum('bhid,bhjd->bhij', q, k)
    attn = jax.nn.softmax(sim, axis=-1)
    out = jnp.einsum('bhij,bhjd->bhid', attn, v)                 # (b, h, n, d)
    out = jnp.transpose(out, (0, 1, 3, 2)).reshape(b, inner, n)  # (b, (h d), n)
    out = jnp.einsum('oc,bcn->bon', w_out[:, :, 0], out) + b_out[None, :, None]
    return out.reshape(b, c, t, hh, w)


if __name__ == "__main__":
    key = jax.random.PRNGKey(0)
    B, DIM, HEADS, DIM_HEAD = 2, 8, 2, 16
    T, H, W = 4, 6, 6            # n = 144 -> padded to 256: exercises masking + tiling
    INNER = HEADS * DIM_HEAD

    ks = jax.random.split(key, 6)
    x = jax.random.normal(ks[0], (B, DIM, T, H, W), dtype=jnp.float32)

    # Deterministic parameter init (synthetic, shapes from the PyTorch __init__).
    g = jnp.ones((1, DIM, 1, 1, 1), jnp.float32) \
        + 0.05 * jax.random.normal(ks[1], (1, DIM, 1, 1, 1), jnp.float32)
    b_ln = 0.05 * jax.random.normal(ks[2], (1, DIM, 1, 1, 1), jnp.float32)
    w_qkv = 0.1 * jax.random.normal(ks[3], (INNER * 3, DIM, 1), jnp.float32)
    w_out = 0.1 * jax.random.normal(ks[4], (DIM, INNER, 1), jnp.float32)
    b_out = 0.05 * jax.random.normal(ks[5], (DIM,), jnp.float32)
    params = (g, b_ln, w_qkv, w_out, b_out)

    ref = global_mhra_ref(x, params, heads=HEADS, dim_head=DIM_HEAD)
    # bf16 MXU operands + (on v6e/v7x) bf16 softmax exponent -> loose-but-meaningful tol.
    TOL = dict(atol=1e-2, rtol=1e-2)

    # Multi-tile path: 2 query tiles, 1 full + 1 masked KV chunk, 144/256 valid positions.
    out = jax.block_until_ready(
        global_mhra(x, params, heads=HEADS, dim_head=DIM_HEAD, tq=128, tk=128))
    assert out.shape == x.shape
    assert jnp.allclose(out, ref, **TOL), "mismatch vs reference (tiled)"

    # Default-tile path: single 256-wide query tile / KV chunk (tail chunk masked).
    out2 = jax.block_until_ready(
        global_mhra(x, params, heads=HEADS, dim_head=DIM_HEAD))
    assert jnp.allclose(out2, ref, **TOL), "mismatch vs reference (default)"

    # Small LN chunk: exercises the double-buffered manual x DMA (2 chunks per batch).
    out3 = jax.block_until_ready(
        global_mhra(x, params, heads=HEADS, dim_head=DIM_HEAD,
                    tq=128, tk=128, ln_chunk=128))
    assert jnp.allclose(out3, ref, **TOL), "mismatch vs reference (chunked DMA)"

    print("KERNEL_OK")
</pallas_src>

<mosaic_0001>
module attributes {stable_mosaic.version = 11 : i64} {
  func.func @_global_mhra_kernel(%arg0: i32, %arg1: i32, %arg2: memref<2x8x256xf32, #tpu.memory_space<any>>, %arg3: memref<8x1xf32, #tpu.memory_space<vmem>>, %arg4: memref<8x1xf32, #tpu.memory_space<vmem>>, %arg5: memref<96x8xbf16, #tpu.memory_space<vmem>>, %arg6: memref<8x32xbf16, #tpu.memory_space<vmem>>, %arg7: memref<8x1xf32, #tpu.memory_space<vmem>>, %arg8: memref<1x8x128xf32, #tpu.memory_space<vmem>>, %arg9: memref<96x256xbf16, #tpu.memory_space<vmem>>, %arg10: memref<32x128xbf16, #tpu.memory_space<vmem>>, %arg11: memref<2x8x256xf32, #tpu.memory_space<vmem>>, %arg12: memref<2x!tpu.dma_semaphore, #tpu.memory_space<semaphore_mem>>) attributes {dimension_semantics = [#tpu.dimension_semantics<parallel>, #tpu.dimension_semantics<arbitrary>], iteration_bounds = array<i64: 2, 2>, scalar_prefetch = 0 : i64, scratch_operands = 4 : i64, tpu.core_type = #tpu.core_type<tc>, window_params = [{}, {pipeline_mode = #tpu.pipeline_mode<synchronous>, transform_indices = @transform_1, window_bounds = array<i64: 8, 1>}, {pipeline_mode = #tpu.pipeline_mode<synchronous>, transform_indices = @transform_2, window_bounds = array<i64: 8, 1>}, {pipeline_mode = #tpu.pipeline_mode<synchronous>, transform_indices = @transform_3, window_bounds = array<i64: 96, 8>}, {pipeline_mode = #tpu.pipeline_mode<synchronous>, transform_indices = @transform_4, window_bounds = array<i64: 8, 32>}, {pipeline_mode = #tpu.pipeline_mode<synchronous>, transform_indices = @transform_5, window_bounds = array<i64: 8, 1>}, {transform_indices = @transform_6, window_bounds = array<i64: 1, 8, 128>}]} {
    %c0_i32 = arith.constant 0 : i32
    %0 = arith.cmpi eq, %arg1, %c0_i32 : i32
    %1 = arith.extui %0 : i1 to i32
    %c0_i32_0 = arith.constant 0 : i32
    %2 = arith.cmpi ne, %1, %c0_i32_0 : i32
    scf.if %2 {
      %c0_11 = arith.constant 0 : index
      %c0_12 = arith.constant 0 : index
      %15 = vector.load %arg3[%c0_11, %c0_12] : memref<8x1xf32, #tpu.memory_space<vmem>>, vector<8x1xf32>
      %c0_13 = arith.constant 0 : index
      %c0_14 = arith.constant 0 : index
      %16 = vector.load %arg4[%c0_13, %c0_14] : memref<8x1xf32, #tpu.memory_space<vmem>>, vector<8x1xf32>
      %c0_15 = arith.constant 0 : index
      %c0_16 = arith.constant 0 : index
      %17 = vector.load %arg5[%c0_15, %c0_16] : memref<96x8xbf16, #tpu.memory_space<vmem>>, vector<96x8xbf16>
      %c0_i32_17 = arith.constant 0 : i32
      %c0_i32_18 = arith.constant 0 : i32
      %c0_i32_19 = arith.constant 0 : i32
      %c0_i32_20 = arith.constant 0 : i32
      %18 = tpu.memref_slice %arg2[%arg0, %c0_i32_19, %c0_i32_20] : memref<2x8x256xf32, #tpu.memory_space<any>> -> memref<1x8x256xf32, #tpu.memory_space<any>>
      %19 = tpu.memref_squeeze %18 : memref<1x8x256xf32, #tpu.memory_space<any>> -> memref<8x256xf32, #tpu.memory_space<any>>
      %c0_i32_21 = arith.constant 0 : i32
      %c0_i32_22 = arith.constant 0 : i32
      %20 = tpu.memref_slice %arg11[%c0_i32_17, %c0_i32_21, %c0_i32_22] : memref<2x8x256xf32, #tpu.memory_space<vmem>> -> memref<1x8x256xf32, #tpu.memory_space<vmem>>
      %21 = tpu.memref_squeeze %20 : memref<1x8x256xf32, #tpu.memory_space<vmem>> -> memref<8x256xf32, #tpu.memory_space<vmem>>
      %22 = tpu.memref_slice %arg12[%c0_i32_18] : memref<2x!tpu.dma_semaphore, #tpu.memory_space<semaphore_mem>> -> memref<1x!tpu.dma_semaphore, #tpu.memory_space<semaphore_mem>>
      %23 = tpu.memref_squeeze %22 : memref<1x!tpu.dma_semaphore, #tpu.memory_space<semaphore_mem>> -> memref<!tpu.dma_semaphore, #tpu.memory_space<semaphore_mem>>
      tpu.enqueue_dma source(%19 : memref<8x256xf32, #tpu.memory_space<any>>) target(%21 : memref<8x256xf32, #tpu.memory_space<vmem>>) target_semaphore(%23 : memref<!tpu.dma_semaphore, #tpu.memory_space<semaphore_mem>>)
      %c0_i32_23 = arith.constant 0 : i32
      %c2_i32_24 = arith.constant 2 : i32
      %24 = arith.remsi %c0_i32_23, %c2_i32_24 : i32
      %c256_i32 = arith.constant 256 : i32
      %25 = arith.muli %c0_i32_23, %c256_i32 : i32
      %26 = tpu.assume_multiple %25, 256 : i32
      %c0_i32_25 = arith.constant 0 : i32
      %27 = tpu.memref_slice %arg2[%arg0, %c0_i32_25, %26] : memref<2x8x256xf32, #tpu.memory_space<any>> -> memref<1x8x256xf32, #tpu.memory_space<any>>
      %28 = tpu.memref_squeeze %27 : memref<1x8x256xf32, #tpu.memory_space<any>> -> memref<8x256xf32, #tpu.memory_space<any>>
      %c0_i32_26 = arith.constant 0 : i32
      %c0_i32_27 = arith.constant 0 : i32
      %29 = tpu.memref_slice %arg11[%24, %c0_i32_26, %c0_i32_27] : memref<2x8x256xf32, #tpu.memory_space<vmem>> -> memref<1x8x256xf32, #tpu.memory_space<vmem>>
      %30 = tpu.memref_squeeze %29 : memref<1x8x256xf32, #tpu.memory_space<vmem>> -> memref<8x256xf32, #tpu.memory_space<vmem>>
      %31 = tpu.memref_slice %arg12[%24] : memref<2x!tpu.dma_semaphore, #tpu.memory_space<semaphore_mem>> -> memref<1x!tpu.dma_semaphore, #tpu.memory_space<semaphore_mem>>
      %32 = tpu.memref_squeeze %31 : memref<1x!tpu.dma_semaphore, #tpu.memory_space<semaphore_mem>> -> memref<!tpu.dma_semaphore, #tpu.memory_space<semaphore_mem>>
      tpu.wait_dma2 semaphore(%32 : memref<!tpu.dma_semaphore, #tpu.memory_space<semaphore_mem>>) src(%28 : memref<8x256xf32, #tpu.memory_space<any>>) dst(%30 : memref<8x256xf32, #tpu.memory_space<vmem>>)
      %c1_i32_28 = arith.constant 1 : i32
      %33 = arith.addi %c0_i32_23, %c1_i32_28 : i32
      %c1_i32_29 = arith.constant 1 : i32
      %34 = arith.cmpi slt, %33, %c1_i32_29 : i32
      %35 = arith.extui %34 : i1 to i32
      %c0_i32_30 = arith.constant 0 : i32
      %36 = arith.cmpi ne, %35, %c0_i32_30 : i32
      scf.if %36 {
        %c1_i32_41 = arith.constant 1 : i32
        %66 = arith.addi %c0_i32_23, %c1_i32_41 : i32
        %c1_i32_42 = arith.constant 1 : i32
        %67 = arith.subi %c1_i32_42, %24 : i32
        %c256_i32_43 = arith.constant 256 : i32
        %68 = arith.muli %66, %c256_i32_43 : i32
        %69 = tpu.assume_multiple %68, 256 : i32
        %c0_i32_44 = arith.constant 0 : i32
        %70 = tpu.memref_slice %arg2[%arg0, %c0_i32_44, %69] : memref<2x8x256xf32, #tpu.memory_space<any>> -> memref<1x8x256xf32, #tpu.memory_space<any>>
        %71 = tpu.memref_squeeze %70 : memref<1x8x256xf32, #tpu.memory_space<any>> -> memref<8x256xf32, #tpu.memory_space<any>>
        %c0_i32_45 = arith.constant 0 : i32
        %c0_i32_46 = arith.constant 0 : i32
        %72 = tpu.memref_slice %arg11[%67, %c0_i32_45, %c0_i32_46] : memref<2x8x256xf32, #tpu.memory_space<vmem>> -> memref<1x8x256xf32, #tpu.memory_space<vmem>>
        %73 = tpu.memref_squeeze %72 : memref<1x8x256xf32, #tpu.memory_space<vmem>> -> memref<8x256xf32, #tpu.memory_space<vmem>>
        %74 = tpu.memref_slice %arg12[%67] : memref<2x!tpu.dma_semaphore, #tpu.memory_space<semaphore_mem>> -> memref<1x!tpu.dma_semaphore, #tpu.memory_space<semaphore_mem>>
        %75 = tpu.memref_squeeze %74 : memref<1x!tpu.dma_semaphore, #tpu.memory_space<semaphore_mem>> -> memref<!tpu.dma_semaphore, #tpu.memory_space<semaphore_mem>>
        tpu.enqueue_dma source(%71 : memref<8x256xf32, #tpu.memory_space<any>>) target(%73 : memref<8x256xf32, #tpu.memory_space<vmem>>) target_semaphore(%75 : memref<!tpu.dma_semaphore, #tpu.memory_space<semaphore_mem>>)
      } else {
      }
      %37 = arith.index_cast %24 : i32 to index
      %c0_31 = arith.constant 0 : index
      %c0_32 = arith.constant 0 : index
      %38 = vector.load %arg11[%37, %c0_31, %c0_32] : memref<2x8x256xf32, #tpu.memory_space<vmem>>, vector<1x8x256xf32>
      %39 = vector.shape_cast %38 : vector<1x8x256xf32> to vector<8x256xf32>
      %cst_33 = arith.constant dense<0.000000e+00> : vector<256xf32>
      %40 = vector.multi_reduction <add>, %39, %cst_33 [0] : vector<8x256xf32> to vector<256xf32>
      %41 = vector.shape_cast %40 : vector<256xf32> to vector<1x256xf32>
      %cst_34 = arith.constant 8.000000e+00 : f32
      %42 = vector.broadcast %cst_34 : f32 to vector<1x256xf32>
      %43 = arith.divf %41, %42 : vector<1x256xf32>
      %44 = vector.broadcast %43 : vector<1x256xf32> to vector<8x256xf32>
      %45 = arith.subf %39, %44 : vector<8x256xf32>
      %46 = arith.mulf %45, %45 : vector<8x256xf32>
      %cst_35 = arith.constant dense<0.000000e+00> : vector<256xf32>
      %47 = vector.multi_reduction <add>, %46, %cst_35 [0] : vector<8x256xf32> to vector<256xf32>
      %48 = vector.shape_cast %47 : vector<256xf32> to vector<1x256xf32>
      %cst_36 = arith.constant 8.000000e+00 : f32
      %49 = vector.broadcast %cst_36 : f32 to vector<1x256xf32>
      %50 = arith.divf %48, %49 : vector<1x256xf32>
      %51 = math.sqrt %50 : vector<1x256xf32>
      %cst_37 = arith.constant 9.99999974E-6 : f32
      %52 = vector.broadcast %cst_37 : f32 to vector<1x256xf32>
      %53 = arith.addf %51, %52 : vector<1x256xf32>
      %54 = tpu.reciprocal %53 : vector<1x256xf32> -> vector<1x256xf32>
      %55 = vector.broadcast %54 : vector<1x256xf32> to vector<8x256xf32>
      %56 = arith.mulf %45, %55 : vector<8x256xf32>
      %57 = vector.broadcast %15 : vector<8x1xf32> to vector<8x256xf32>
      %58 = arith.mulf %56, %57 : vector<8x256xf32>
      %59 = vector.broadcast %16 : vector<8x1xf32> to vector<8x256xf32>
      %60 = arith.addf %58, %59 : vector<8x256xf32>
      %61 = arith.truncf %60 : vector<8x256xf32> to vector<8x256xbf16>
      %cst_38 = arith.constant dense<0.000000e+00> : vector<96x256xf32>
      %62 = tpu.matmul %17, %61, %cst_38 {dimension_numbers = #tpu.dot_dimension_numbers<[1], [0], [0], [1], [0, 0, 1, 1], [], []>} : vector<96x8xbf16>, vector<8x256xbf16>, vector<96x256xf32> -> vector<96x256xf32>
      %63 = arith.truncf %62 : vector<96x256xf32> to vector<96x256xbf16>
      %c0_39 = arith.constant 0 : index
      %64 = arith.index_cast %26 : i32 to index
      %65 = vector.load %arg9[%c0_39, %64] : memref<96x256xbf16, #tpu.memory_space<vmem>>, vector<96x256xbf16>
      tpu.vector_store %arg9[%c0_39, %64], %63 {strides = array<i32>} : memref<96x256xbf16, #tpu.memory_space<vmem>>, vector<96x256xbf16>,
      %c1_i32_40 = arith.constant 1 : i32
    } else {
    }
    %c128_i32 = arith.constant 128 : i32
    %3 = arith.muli %arg1, %c128_i32 : i32
    %4 = tpu.assume_multiple %3, 128 : i32
    %c0_i32_1 = arith.constant 0 : i32
    %c2_i32 = arith.constant 2 : i32
    %5 = arith.addi %c0_i32_1, %c2_i32 : i32
    %c1_i32 = arith.constant 1 : i32
    scf.for %arg13 = %c0_i32_1 to %5 step %c1_i32  : i32 {
      %c16_i32 = arith.constant 16 : i32
      %15 = arith.muli %arg13, %c16_i32 : i32
      %16 = tpu.assume_multiple %15, 16 : i32
      %c16_i32_11 = arith.constant 16 : i32
      %17 = arith.muli %arg13, %c16_i32_11 : i32
      %c32_i32 = arith.constant 32 : i32
      %18 = arith.addi %c32_i32, %17 : i32
      %19 = tpu.assume_multiple %18, 16 : i32
      %c16_i32_12 = arith.constant 16 : i32
      %20 = arith.muli %arg13, %c16_i32_12 : i32
      %c64_i32 = arith.constant 64 : i32
      %21 = arith.addi %c64_i32, %20 : i32
      %22 = tpu.assume_multiple %21, 16 : i32
      %23 = arith.index_cast %16 : i32 to index
      %24 = arith.index_cast %4 : i32 to index
      %25 = vector.load %arg9[%23, %24] : memref<96x256xbf16, #tpu.memory_space<vmem>>, vector<16x128xbf16>
      %cst_13 = arith.constant -1.000000e+30 : f32
      %26 = vector.broadcast %cst_13 : f32 to vector<1x128xf32>
      %cst_14 = arith.constant 0.000000e+00 : f32
      %27 = vector.broadcast %cst_14 : f32 to vector<1x128xf32>
      %cst_15 = arith.constant 0.000000e+00 : f32
      %28 = vector.broadcast %cst_15 : f32 to vector<16x128xf32>
      %c0_i32_16 = arith.constant 0 : i32
      %c128_i32_17 = arith.constant 128 : i32
      %29 = arith.muli %c0_i32_16, %c128_i32_17 : i32
      %30 = tpu.assume_multiple %29, 128 : i32
      %31 = arith.index_cast %19 : i32 to index
      %32 = arith.index_cast %30 : i32 to index
      %33 = vector.load %arg9[%31, %32] : memref<96x256xbf16, #tpu.memory_space<vmem>>, vector<16x128xbf16>
      %34 = arith.index_cast %22 : i32 to index
      %35 = arith.index_cast %30 : i32 to index
      %36 = vector.load %arg9[%34, %35] : memref<96x256xbf16, #tpu.memory_space<vmem>>, vector<16x128xbf16>
      %cst_18 = arith.constant dense<0.000000e+00> : vector<128x128xf32>
      %37 = tpu.matmul %33, %25, %cst_18 {dimension_numbers = #tpu.dot_dimension_numbers<[0], [0], [1], [1], [0, 1, 1, 1], [], []>} : vector<16x128xbf16>, vector<16x128xbf16>, vector<128x128xf32> -> vector<128x128xf32>
      %cst_19 = arith.constant dense<0xFF800000> : vector<128xf32>
      %38 = vector.multi_reduction <maximumf>, %37, %cst_19 [0] : vector<128x128xf32> to vector<128xf32>
      %39 = vector.shape_cast %38 : vector<128xf32> to vector<1x128xf32>
      %40 = arith.maximumf %26, %39 : vector<1x128xf32>
      %41 = arith.subf %26, %40 : vector<1x128xf32>
      %42 = math.exp %41 : vector<1x128xf32>
      %43 = vector.broadcast %40 : vector<1x128xf32> to vector<128x128xf32>
      %44 = arith.subf %37, %43 : vector<128x128xf32>
      %45 = math.exp %44 : vector<128x128xf32>
      %cst_20 = arith.constant dense<0.000000e+00> : vector<128xf32>
      %46 = vector.multi_reduction <add>, %45, %cst_20 [0] : vector<128x128xf32> to vector<128xf32>
      %47 = vector.shape_cast %46 : vector<128xf32> to vector<1x128xf32>
      %48 = arith.truncf %45 : vector<128x128xf32> to vector<128x128xbf16>
      %49 = arith.mulf %42, %27 : vector<1x128xf32>
      %50 = arith.addf %49, %47 : vector<1x128xf32>
      %51 = vector.broadcast %42 : vector<1x128xf32> to vector<16x128xf32>
      %52 = arith.mulf %51, %28 : vector<16x128xf32>
      %cst_21 = arith.constant dense<0.000000e+00> : vector<16x128xf32>
      %53 = tpu.matmul %36, %48, %cst_21 {dimension_numbers = #tpu.dot_dimension_numbers<[1], [0], [0], [1], [0, 0, 1, 1], [], []>} : vector<16x128xbf16>, vector<128x128xbf16>, vector<16x128xf32> -> vector<16x128xf32>
      %54 = arith.addf %52, %53 : vector<16x128xf32>
      %c1_i32_22 = arith.constant 1 : i32
      %55 = arith.index_cast %19 : i32 to index
      %c128 = arith.constant 128 : index
      %56 = vector.load %arg9[%55, %c128] : memref<96x256xbf16, #tpu.memory_space<vmem>>, vector<16x128xbf16>
      %57 = arith.index_cast %22 : i32 to index
      %c128_23 = arith.constant 128 : index
      %58 = vector.load %arg9[%57, %c128_23] : memref<96x256xbf16, #tpu.memory_space<vmem>>, vector<16x128xbf16>
      %cst_24 = arith.constant dense<0.000000e+00> : vector<128x128xf32>
      %59 = tpu.matmul %56, %25, %cst_24 {dimension_numbers = #tpu.dot_dimension_numbers<[0], [0], [1], [1], [0, 1, 1, 1], [], []>} : vector<16x128xbf16>, vector<16x128xbf16>, vector<128x128xf32> -> vector<128x128xf32>
      %60 = tpu.iota {dimensions = array<i32: 0>} : vector<128x1xi32>
      %c128_i32_25 = arith.constant 128 : i32
      %61 = vector.broadcast %c128_i32_25 : i32 to vector<128x1xi32>
      %62 = arith.addi %60, %61 : vector<128x1xi32>
      %c144_i32 = arith.constant 144 : i32
      %63 = vector.broadcast %c144_i32 : i32 to vector<128x1xi32>
      %64 = arith.cmpi slt, %62, %63 : vector<128x1xi32>
      %cst_26 = arith.constant -1.000000e+30 : f32
      %65 = vector.shape_cast %64 : vector<128x1xi1> to vector<128x1xi1>
      %66 = vector.broadcast %65 : vector<128x1xi1> to vector<128x128xi1>
      %67 = vector.broadcast %cst_26 : f32 to vector<128x128xf32>
      %68 = arith.select %66, %59, %67 : vector<128x128xi1>, vector<128x128xf32>
      %cst_27 = arith.constant dense<0xFF800000> : vector<128xf32>
      %69 = vector.multi_reduction <maximumf>, %68, %cst_27 [0] : vector<128x128xf32> to vector<128xf32>
      %70 = vector.shape_cast %69 : vector<128xf32> to vector<1x128xf32>
      %71 = arith.maximumf %40, %70 : vector<1x128xf32>
      %72 = arith.subf %40, %71 : vector<1x128xf32>
      %73 = math.exp %72 : vector<1x128xf32>
      %74 = vector.broadcast %71 : vector<1x128xf32> to vector<128x128xf32>
      %75 = arith.subf %68, %74 : vector<128x128xf32>
      %76 = math.exp %75 : vector<128x128xf32>
      %cst_28 = arith.constant dense<0.000000e+00> : vector<128xf32>
      %77 = vector.multi_reduction <add>, %76, %cst_28 [0] : vector<128x128xf32> to vector<128xf32>
      %78 = vector.shape_cast %77 : vector<128xf32> to vector<1x128xf32>
      %79 = arith.truncf %76 : vector<128x128xf32> to vector<128x128xbf16>
      %80 = arith.mulf %73, %50 : vector<1x128xf32>
      %81 = arith.addf %80, %78 : vector<1x128xf32>
      %82 = vector.broadcast %73 : vector<1x128xf32> to vector<16x128xf32>
      %83 = arith.mulf %82, %54 : vector<16x128xf32>
      %cst_29 = arith.constant dense<0.000000e+00> : vector<16x128xf32>
      %84 = tpu.matmul %58, %79, %cst_29 {dimension_numbers = #tpu.dot_dimension_numbers<[1], [0], [0], [1], [0, 0, 1, 1], [], []>} : vector<16x128xbf16>, vector<128x128xbf16>, vector<16x128xf32> -> vector<16x128xf32>
      %85 = arith.addf %83, %84 : vector<16x128xf32>
      %86 = tpu.reciprocal %81 {approx = true} : vector<1x128xf32> -> vector<1x128xf32>
      %87 = vector.broadcast %86 : vector<1x128xf32> to vector<16x128xf32>
      %88 = arith.mulf %85, %87 : vector<16x128xf32>
      %89 = arith.truncf %88 : vector<16x128xf32> to vector<16x128xbf16>
      %90 = arith.index_cast %16 : i32 to index
      %c0_30 = arith.constant 0 : index
      %91 = vector.load %arg10[%90, %c0_30] : memref<32x128xbf16, #tpu.memory_space<vmem>>, vector<16x128xbf16>
      tpu.vector_store %arg10[%90, %c0_30], %89 {strides = array<i32>} : memref<32x128xbf16, #tpu.memory_space<vmem>>, vector<16x128xbf16>,
    }
    %c2_i32_2 = arith.constant 2 : i32
    %c0 = arith.constant 0 : index
    %c0_3 = arith.constant 0 : index
    %6 = vector.load %arg6[%c0, %c0_3] : memref<8x32xbf16, #tpu.memory_space<vmem>>, vector<8x32xbf16>
    %c0_4 = arith.constant 0 : index
    %c0_5 = arith.constant 0 : index
    %7 = vector.load %arg10[%c0_4, %c0_5] : memref<32x128xbf16, #tpu.memory_space<vmem>>, vector<32x128xbf16>
    %cst = arith.constant dense<0.000000e+00> : vector<8x128xf32>
    %8 = tpu.matmul %6, %7, %cst {dimension_numbers = #tpu.dot_dimension_numbers<[1], [0], [0], [1], [0, 0, 1, 1], [], []>} : vector<8x32xbf16>, vector<32x128xbf16>, vector<8x128xf32> -> vector<8x128xf32>
    %c0_6 = arith.constant 0 : index
    %c0_7 = arith.constant 0 : index
    %9 = vector.load %arg7[%c0_6, %c0_7] : memref<8x1xf32, #tpu.memory_space<vmem>>, vector<8x1xf32>
    %10 = vector.broadcast %9 : vector<8x1xf32> to vector<8x128xf32>
    %11 = arith.addf %8, %10 : vector<8x128xf32>
    %c0_8 = arith.constant 0 : index
    %c0_9 = arith.constant 0 : index
    %c0_10 = arith.constant 0 : index
    %12 = vector.load %arg8[%c0_8, %c0_9, %c0_10] : memref<1x8x128xf32, #tpu.memory_space<vmem>>, vector<1x8x128xf32>
    %13 = vector.shape_cast %12 : vector<1x8x128xf32> to vector<8x128xf32>
    %14 = vector.shape_cast %11 : vector<8x128xf32> to vector<1x8x128xf32>
    tpu.vector_store %arg8[%c0_8, %c0_9, %c0_10], %14 {strides = array<i32>} : memref<1x8x128xf32, #tpu.memory_space<vmem>>, vector<1x8x128xf32>,
    return
  }
  func.func @transform_1(%arg0: i32, %arg1: i32) -> (i32, i32) {
    %c0_i32 = arith.constant 0 : i32
    %c0_i32_0 = arith.constant 0 : i32
    %c0_i32_1 = arith.constant 0 : i32
    return %c0_i32, %c0_i32_0 : i32, i32
  }
  func.func @transform_2(%arg0: i32, %arg1: i32) -> (i32, i32) {
    %c0_i32 = arith.constant 0 : i32
    %c0_i32_0 = arith.constant 0 : i32
    %c0_i32_1 = arith.constant 0 : i32
    return %c0_i32, %c0_i32_0 : i32, i32
  }
  func.func @transform_3(%arg0: i32, %arg1: i32) -> (i32, i32) {
    %c0_i32 = arith.constant 0 : i32
    %c0_i32_0 = arith.constant 0 : i32
    %c0_i32_1 = arith.constant 0 : i32
    return %c0_i32, %c0_i32_0 : i32, i32
  }
  func.func @transform_4(%arg0: i32, %arg1: i32) -> (i32, i32) {
    %c0_i32 = arith.constant 0 : i32
    %c0_i32_0 = arith.constant 0 : i32
    %c0_i32_1 = arith.constant 0 : i32
    return %c0_i32, %c0_i32_0 : i32, i32
  }
  func.func @transform_5(%arg0: i32, %arg1: i32) -> (i32, i32) {
    %c0_i32 = arith.constant 0 : i32
    %c0_i32_0 = arith.constant 0 : i32
    %c0_i32_1 = arith.constant 0 : i32
    return %c0_i32, %c0_i32_0 : i32, i32
  }
  func.func @transform_6(%arg0: i32, %arg1: i32) -> (i32, i32, i32) {
    %c0_i32 = arith.constant 0 : i32
    %c0_i32_0 = arith.constant 0 : i32
    return %arg0, %c0_i32, %arg1 : i32, i32, i32
  }
}

</mosaic_0001>

<bundles_post_ra>
// kernel: tpu_custom_call.1
= control target key start
LH: loop header
LB: loop body
LE: loop exit
PB: predicated region body
PF: predicated region fallthrough
CT: control target
= control target key end

     0   :  { %s2288_s0 = inlined_call_operand.vmem [shape: f32[2,8,256], index: 0, kind: input, shape index: {}]   ;;  %s2289_s1 = inlined_call_operand.vmem [shape: f32[8,1], index: 1, kind: input, shape index: {}]   ;;  %s2290_s2 = inlined_call_operand.vmem [shape: f32[8,1], index: 2, kind: input, shape index: {}]   ;;  %s2291_s3 = inlined_call_operand.vmem [shape: bf16[96,8], index: 3, kind: input, shape index: {}]   ;;  %s2292_s4 = inlined_call_operand.vmem [shape: bf16[8,32], index: 4, kind: input, shape index: {}]   ;;  %s2293_s5 = inlined_call_operand.vmem [shape: f32[8,1], index: 5, kind: input, shape index: {}]   ;;  %s2294_s6 = inlined_call_operand.hbm [shape: f32[2,8,256], index: 6, kind: output, shape index: {}]  }
   0x1   :  { %2297 = sst [smem:[#allocation12_spill]] %s2288_s0 }
   0x2   :  { %2298 = sst [smem:[#allocation13_spill]] %s2289_s1 }
   0x3   :  { %11 = vsyncpa [#allocation7], 0 }
   0x4   :  { %13 = vsyncpa [#allocation7 + $0x1], 0  ;;  %s1894_s21 = smov 0   ;;  %s1896_s22 = smov 0  }
   0x5   :  { %s1898_s23 = smov 0   ;;  %s1900_s24 = smov 0  }
   0x6   :  { %s1902_s25 = smov 0   ;;  %s1904_s26 = smov 0  }
   0x7   :  { %s1906_s27 = smov 0   ;;  %s1908_s28 = smov 0  }
   0x8 LB: > { %s1420_s29 = sadd.s32 4294967295, %s1846_s28   ;;  %s1421_s30 = sadd.s32 4294967294, %s1846_s28   ;;  %s1846_s28 = sphi %s1908_s28, %s19_s28   ;;  %s1842_s27 = sphi %s1906_s27, %s2314_s27   ;;  %s1838_s26 = sphi %s1904_s26, %s2313_s26   ;;  %s1834_s25 = sphi %s1902_s25, %s2312_s25   ;;  %s1830_s24 = sphi %s1900_s24, %s2311_s24   ;;  %s1826_s23 = sphi %s1898_s23, %s2310_s23   ;;  %s1822_s22 = sphi %s1896_s22, %s2309_s22   ;;  %s1818_s21 = sphi %s1894_s21, %s2308_s21  }
   0x9   : > { %s28_s7 = sadd.s32 1, %s1838_s26  ;;  %s31_s8 = sadd.s32 1, %s1842_s27 }
   0xa   : > { %p29_p0 = scmp.ge.s32.totalorder %s28_s7, 2  ;;  %p155_p1 = scmp.ne.s32.totalorder %s1826_s23, %s1822_s22 }
   0xb   : > { %p156_p2 = scmp.eq.s32.totalorder %s1420_s29, 3  ;;  %p161_p5 = scmp.ne.s32.totalorder %s1822_s22, %s1818_s21 }
   0xc   : > { %s2316_s7 = smov (%p29_p0, %s28_s7), 0  ;;  %s2318_s8 = smov (!%p29_p0, %s31_s8), %s1842_s27 }
   0xd   : > { %s141_s9 = ssub.s32 %s1838_s26, %s2316_s7  ;;  %p1945_p3 = por %p156_p2, %p155_p1 }
   0xe   : > { %p33_p4 = scmp.ge.s32.totalorder %s2318_s8, 2  ;;  %p162_p6 = scmp.eq.s32.totalorder %s1421_s30, 3 }
   0xf   : > { %p1423_p7 = scmp.ge.s32.totalorder %s1846_s28, 1  ;;  %p195_p9 = scmp.lt.s32.totalorder %s1846_s28, 5 }
  0x10   : > { %s2320_s8 = smov (%p33_p4, %s2318_s8), 0  ;;  %p1954_p8 = por %p162_p6, %p161_p5 }
  0x11   : > { %2300 = sst [smem:[#allocation11_spill]] %s2320_s8  ;;  %s140_s12 = ssub.s32 %s1842_s27, %s2320_s8 }
  0x12   : > { %s145_s13 = sadd.s32 1, %s1826_s23  ;;  %s142_s14 = sor.u32 %s141_s9, %s140_s12 }
  0x13   : > { %p196_p10 = pnand %p1423_p7, %p195_p9  ;;  %p143_p11 = scmp.eq.s32.totalorder %s142_s14, 0 }
  0x14   : > { %s2295_s16 = sand.u32 (!%p196_p10), 1, %s1822_s22   ;;  %p1425_p12 = scmp.ne.s32.totalorder (!%p196_p10), %s1830_s24, 0 }
  0x15   : > { %s1963_s15 = scalar_select %p143_p11, %s1826_s23, %s145_s13  }
  0x16   : > { %199 = sbr.rel (%p196_p10) target bundleno = 1333 (0x535), region = 40  ;;  %s1968_s17 = sshll.u32 (!%p196_p10), %s2295_s16, 3 }
  0x1d   : > { %222 = sbr.rel (%p1425_p12) target bundleno = 416 (0x1a0), region = 44  ;;  %s2302_s1 = sld [smem:[#allocation13_spill]] (!%p1425_p12)  ;;  %v224_v1 = vld [vmem:[%s2290_s2] sm:$0xff] (!%p1425_p12)  ;;  %v1992_v4 = vld [vmem:[%s2291_s3 + $0x8] sm:$0xf] (!%p1425_p12) }
  0x1e   : > { %v1981_v2 = vld [vmem:[%s2291_s3] sm:$0xf] (!%p1425_p12)  ;;  %s1476_s13 = sshll.u32 (!%p1425_p12), %s1834_s25, 4  ;;  %v1987_v3 = vld [vmem:[%s2291_s3 + $0x4] sm:$0xf] (!%p1425_p12)  ;;  %s2303_s0 = sld [smem:[#allocation12_spill]] (!%p1425_p12) }
  0x1f   : > { %v1997_v5 = vld [vmem:[%s2291_s3 + $0xc] sm:$0xf] (!%p1425_p12)  ;;  %v2005_v6 = vld [vmem:[%s2291_s3 + $0x10] sm:$0xf] (!%p1425_p12)  ;;  %v2010_v7 = vld [vmem:[%s2291_s3 + $0x14] sm:$0xf] (!%p1425_p12) }
  0x20   : > { %v2015_v8 = vld [vmem:[%s2291_s3 + $0x18] sm:$0xf] (!%p1425_p12)  ;;  %v2020_v9 = vld [vmem:[%s2291_s3 + $0x1c] sm:$0xf] (!%p1425_p12)  ;;  %v2025_v10 = vld [vmem:[%s2291_s3 + $0x20] sm:$0xf] (!%p1425_p12) }
  0x21   : > { %v2030_v11 = vld [vmem:[%s2291_s3 + $0x24] sm:$0xf] (!%p1425_p12)  ;;  %v2035_v12 = vld [vmem:[%s2291_s3 + $0x28] sm:$0xf] (!%p1425_p12)  ;;  %v2040_v13 = vld [vmem:[%s2291_s3 + $0x2c] sm:$0xf] (!%p1425_p12) }
  0x23   : > { %v223_v0 = vld [vmem:[%s2302_s1] sm:$0xff] (!%p1425_p12) }
  0x24   : > { %s239_s9 = scalar_lea.vmem %s2303_s0, %s1476_s13 }
  0x25   : > { %v272_v14 = vld [vmem:[%s239_s9] sm:$0xff]  ;;  %v274_v15 = vld [vmem:[%s239_s9 + $0x8] sm:$0xff] }
  0x26   : > { %283 = vsyncadd [#allocation5], 256 }
  0x27   : > { %1810 = dma.done.wait [#allocation5], 256 }
  0x28   : > { %1811 = vsyncadd [#allocation5], 4294967040  ;;  %v1852_v16 = vmov 0   ;;  %v290_v17 = vrot.slane %v272_v14, 4  ;;  %v296_v18 = vrot.slane %v274_v15, 4  ;;  %vm408_vm4 = vcmask 1043456  }
  0x29   : > { %1692 = vset.pattern.permute.xlu0 %v1852_v16  ;;  %447 = vmatprep.mubr.bf16.mxu0 %v1852_v16  ;;  %vm389_vm5 = vcmask 64512  }
  0x2a   : > { %345 = vperm.xlu0 %1692, %v223_v0   ;;  %477 = vmatprep.mubr.bf16.mxu1 %v1852_v16  ;;  %v291_v19 = vadd.f32 %v290_v17, %v272_v14  ;;  %v297_v20 = vadd.f32 %v296_v18, %v274_v15 }
  0x2c   : > { %v292_v21 = vrot.slane %v291_v19, 2  ;;  %v298_v22 = vrot.slane %v297_v20, 2 }
  0x2e   : > { %352 = vperm.xlu0 %1692, %v224_v1   ;;  %v293_v23 = vadd.f32 %v292_v21, %v291_v19  ;;  %v299_v24 = vadd.f32 %v298_v22, %v297_v20 }
  0x30   : > { %v294_v25 = vrot.slane %v293_v23, 1  ;;  %v300_v26 = vrot.slane %v299_v24, 1 }
  0x32   : > { %v295_v27 = vadd.f32 %v294_v25, %v293_v23  ;;  %v301_v28 = vadd.f32 %v300_v26, %v299_v24  ;;  %v1428_v23 = vcombine.low %v1981_v2, %v1987_v3  ;;  %v1431_v24 = vcombine.low %v2015_v8, %v2020_v9 }
  0x33   : > { %v1429_v25 = vcombine.low %v1992_v4, %v1997_v5  ;;  %v1432_v26 = vcombine.low %v2025_v10, %v2030_v11  ;;  %v1430_v2 = vcombine.low %v2005_v6, %v2010_v7  ;;  %v1433_v3 = vcombine.low %v2035_v12, %v2040_v13 }
  0x34   : > { %v303_v29 = vmul.f32 0.125, %v295_v27  ;;  %v304_v30 = vmul.f32 0.125, %v301_v28 }
  0x36   : > { %v305_v31 = vsub.f32 %v272_v14, %v303_v29  ;;  %v306_v32 = vsub.f32 %v274_v15, %v304_v30 }
  0x38   : > { %v307_v33 = vmul.f32 %v305_v31, %v305_v31  ;;  %v308_v34 = vmul.f32 %v306_v32, %v306_v32 }
  0x3a   : > { %v309_v35 = vrot.slane %v307_v33, 4  ;;  %v315_v36 = vrot.slane %v308_v34, 4 }
  0x3c   : > { %v310_v37 = vadd.f32 %v309_v35, %v307_v33  ;;  %v316_v38 = vadd.f32 %v315_v36, %v308_v34 }
  0x3e   : > { %v311_v39 = vrot.slane %v310_v37, 2  ;;  %v317_v40 = vrot.slane %v316_v38, 2 }
  0x40   : > { %v312_v41 = vadd.f32 %v311_v39, %v310_v37  ;;  %v318_v42 = vadd.f32 %v317_v40, %v316_v38 }
  0x42   : > { %v313_v43 = vrot.slane %v312_v41, 1  ;;  %v319_v44 = vrot.slane %v318_v42, 1 }
  0x44   : > { %v314_v45 = vadd.f32 %v313_v43, %v312_v41  ;;  %v320_v46 = vadd.f32 %v319_v44, %v318_v42 }
  0x46   : > { %v321_v47 = vmul.f32 0.125, %v314_v45  ;;  %v322_v48 = vmul.f32 0.125, %v320_v46 }
  0x48   : > { %1693 = vrsqrt.f32 %v321_v47  ;;  %vm325_vm0 = vcmp.eq.f32.partialorder %v321_v47, inf  ;;  %vm332_vm1 = vcmp.eq.f32.partialorder %v322_v48, inf  ;;  %v328_v53 = vand.u32 2147483648, %v321_v47 }
  0x49   : > { %1695 = vrsqrt.f32 %v322_v48  ;;  %vm327_vm2 = vcmp.eq.f32.partialorder %v321_v47, 0.0  ;;  %v335_v55 = vand.u32 2147483648, %v322_v48  ;;  %vm334_vm3 = vcmp.eq.f32.partialorder %v322_v48, 0.0 }
  0x52   : > { %v1694_v49 = vpop.eup %1693 }
  0x53   : > { %v1696_v50 = vpop.eup %1695  ;;  %v324_v51 = vmul.f32 %v1694_v49, %v321_v47 }
  0x54   : > { %v331_v52 = vmul.f32 %v1696_v50, %v322_v48 }
  0x55   : > { %v326_v54 = vsel %vm325_vm0, %v321_v47, %v324_v51 }
  0x56   : > { %v333_v56 = vsel %vm332_vm1, %v322_v48, %v331_v52  ;;  %v329_v57 = vsel %vm327_vm2, %v328_v53, %v326_v54 }
  0x57   : > { %v336_v58 = vsel %vm334_vm3, %v335_v55, %v333_v56  ;;  %v337_v59 = vadd.f32 1e-05, %v329_v57 }
  0x58   : > { %v338_v60 = vadd.f32 1e-05, %v336_v58 }
  0x59   : > { %1697 = vrcp.f32 %v337_v59 }
  0x5a   : > { %1699 = vrcp.f32 %v338_v60 }
  0x63   : > { %v1698_v61 = vpop.eup %1697 }
  0x64   : > { %v1700_v62 = vpop.eup %1699  ;;  %v341_v63 = vmul.f32 %v1698_v61, %v305_v31 }
  0x65   : > { %v342_v0 = vmul.f32 %v1700_v62, %v306_v32 }
  0xa9   : > { %v346_v1 = vpop.permute.xlu0 %345 }
  0xaa   : > { %v348_v14 = vmul.f32 %v346_v1, %v341_v63  ;;  %v349_v15 = vmul.f32 %v346_v1, %v342_v0 }
  0xad   : > { %v353_v17 = vpop.permute.xlu0 %352 }
  0xae   : > { %v355_v18 = vadd.f32 %v353_v17, %v348_v14  ;;  %v356_v19 = vadd.f32 %v353_v17, %v349_v15 }
  0xb0   : > { %v357_v20 = vpack.c.bf16 %v355_v18, %v355_v18  ;;  %v358_v21 = vpack.c.bf16 %v356_v19, %v356_v19 }
  0xb2   : > { %1434 = vmatprep.subr.msk.bf16.mxu0 %vm408_vm4, %v358_v21  ;;  %1604 = vmatprep.subr.msk.bf16.mxu1 %vm408_vm4, %v358_v21  ;;  %v410_v22 = vsel %vm408_vm4, %v357_v20, 0 }
  0xb3   : > { %416 = vmatpush1.bf16.msra.mxu0 %v410_v22  ;;  %1605 = vmatpush1.bf16.msra.mxu1 %v410_v22 }
  0xb6   : > { %1435 = vmatmul.mubr.msk.bf16.vlgmr.msra.gmra.mrb[0].mxu0 %vm389_vm5, %v1428_v23  ;;  %1438 = vmatmul.mubr.msk.bf16.vlgmr.msra.gmra.mrb[0].mxu1 %vm389_vm5, %v1431_v24 }
  0xb7   : > { %457 = vmatprep.mubr.bf16.mxu0 %v1852_v16  ;;  %487 = vmatprep.mubr.bf16.mxu1 %v1852_v16 }
  0xbe   : > { %1436 = vmatmul.mubr.msk.bf16.gmra.mrb[4].mxu0 %vm389_vm5, %v1429_v25  ;;  %1439 = vmatmul.mubr.msk.bf16.gmra.mrb[4].mxu1 %vm389_vm5, %v1432_v26 }
  0xbf   : > { %467 = vmatprep.mubr.bf16.mxu0 %v1852_v16  ;;  %497 = vmatprep.mubr.bf16.mxu1 %v1852_v16 }
  0xc6   : > { %1437 = vmatmul.mubr.msk.bf16.gmra.mrb[8].mxu0 %vm389_vm5, %v1430_v2  ;;  %1440 = vmatmul.mubr.msk.bf16.gmra.mrb[8].mxu1 %vm389_vm5, %v1433_v3 }
 0x189   : > { %v449_v8 = vpop.f32.mrb[0].mxu0  ;;  %v479_v9 = vpop.f32.mrb[0].mxu1 }
 0x18a   : > { %v451_v4 = vpop.f32.mrb[1].mxu0  ;;  %v481_v5 = vpop.f32.mrb[1].mxu1 }
 0x18b   : > { %v453_v27 = vpop.f32.mrb[2].mxu0  ;;  %v483_v10 = vpop.f32.mrb[2].mxu1 }
 0x18c   : > { %v508_v11 = vpack.c.bf16 %v453_v27, %v449_v8  ;;  %v514_v28 = vpack.c.bf16 %v483_v10, %v479_v9  ;;  %v455_v29 = vpop.f32.mrb[3].mxu0  ;;  %v485_v30 = vpop.f32.mrb[3].mxu1 }
 0x18d   : > { %v509_v31 = vpack.c.bf16 %v455_v29, %v451_v4  ;;  %v515_v16 = vpack.c.bf16 %v485_v30, %v481_v5 }
 0x18e   : > { %520 = vst [vmem:[#allocation2] sm:$0xff] %v508_v11  ;;  %526 = vst [vmem:[#allocation2 + $0x30] sm:$0xff] %v514_v28 }
 0x18f   : > { %521 = vst [vmem:[#allocation2 + $0x8] sm:$0xff] %v509_v31  ;;  %527 = vst [vmem:[#allocation2 + $0x38] sm:$0xff] %v515_v16 }
 0x191   : > { %v459_v6 = vpop.f32.mrb[4].mxu0  ;;  %v489_v7 = vpop.f32.mrb[4].mxu1 }
 0x192   : > { %v461_v12 = vpop.f32.mrb[5].mxu0  ;;  %v491_v13 = vpop.f32.mrb[5].mxu1 }
 0x193   : > { %v463_v32 = vpop.f32.mrb[6].mxu0  ;;  %v493_v33 = vpop.f32.mrb[6].mxu1 }
 0x194   : > { %v510_v34 = vpack.c.bf16 %v463_v32, %v459_v6  ;;  %v516_v35 = vpack.c.bf16 %v493_v33, %v489_v7  ;;  %v465_v36 = vpop.f32.mrb[7].mxu0  ;;  %v495_v37 = vpop.f32.mrb[7].mxu1 }
 0x195   : > { %v511_v38 = vpack.c.bf16 %v465_v36, %v461_v12  ;;  %v517_v39 = vpack.c.bf16 %v495_v37, %v491_v13 }
 0x196   : > { %522 = vst [vmem:[#allocation2 + $0x10] sm:$0xff] %v510_v34  ;;  %528 = vst [vmem:[#allocation2 + $0x40] sm:$0xff] %v516_v35 }
 0x197   : > { %523 = vst [vmem:[#allocation2 + $0x18] sm:$0xff] %v511_v38  ;;  %529 = vst [vmem:[#allocation2 + $0x48] sm:$0xff] %v517_v39 }
 0x199   : > { %v469_v40 = vpop.f32.mrb[8].mxu0  ;;  %v499_v41 = vpop.f32.mrb[8].mxu1 }
 0x19a   : > { %v471_v42 = vpop.f32.mrb[9].mxu0  ;;  %v501_v43 = vpop.f32.mrb[9].mxu1 }
 0x19b   : > { %v473_v44 = vpop.f32.mrb[10].mxu0  ;;  %v503_v45 = vpop.f32.mrb[10].mxu1 }
 0x19c   : > { %v512_v46 = vpack.c.bf16 %v473_v44, %v469_v40  ;;  %v518_v47 = vpack.c.bf16 %v503_v45, %v499_v41  ;;  %v475_v48 = vpop.f32.mrb[11].mxu0  ;;  %v505_v49 = vpop.f32.mrb[11].mxu1 }
 0x19d   : > { %v513_v50 = vpack.c.bf16 %v475_v48, %v471_v42  ;;  %v519_v51 = vpack.c.bf16 %v505_v49, %v501_v43 }
 0x19e   : > { %524 = vst [vmem:[#allocation2 + $0x20] sm:$0xff] %v512_v46  ;;  %530 = vst [vmem:[#allocation2 + $0x50] sm:$0xff] %v518_v47 }
 0x19f   : > { %525 = vst [vmem:[#allocation2 + $0x28] sm:$0xff] %v513_v50  ;;  %531 = vst [vmem:[#allocation2 + $0x58] sm:$0xff] %v519_v51 }
 0x1a0 PF: > { %s1441_s9 = sshll.u32 %s1830_s24, 7  ;;  %s2062_s18 = smov 0  }
 0x1a1 LB: >> { %s2068_s19 = sshll.u32 %s1850_s18, 4  ;;  %s542_s1 = sshra.s32 %s1441_s9, 7  ;;  %vm581_vm6 = vcmask 130048   ;;  %v1853_v1 = vmov 0.0   ;;  %vm1854_vm7 = vmmov 0   ;;  %s1850_s18 = sphi %s2062_s18, %s538_s18  }
 0x1a2   : >> { %s540_s20 = sadd.s32 32, %s2068_s19  ;;  %s544_s13 = sshra.s32 %s2068_s19, 4  ;;  %1538 = vmatprep.subr.bf16.mxu1 %v1853_v1  ;;  %1554 = vmatprep.mubr.msk.bf16.mxu1 %vm1854_vm7, %v1853_v1 }
 0x1a3   : >> { %s551_s29 = sshra.s32 %s540_s20, 4  ;;  %s1443_s12 = sshll.u32 %s544_s13, 1 }
 0x1a4   : >> { %s1477_s30 = sshll.u32 %s551_s29, 4  ;;  %s547_s14 = sadd.s32 %s1443_s12, %s542_s1 }
 0x1a5   : >> { %s556_s16 = scalar_lea.vmem [#allocation2], %s1477_s30  ;;  %s1444_s8 = sshll.u32 %s547_s14, 3 }
 0x1a6   : >> { %v557_v52 = vld [vmem:[%s556_s16] sm:$0xff]  ;;  %s549_s0 = scalar_lea.vmem [#allocation2], %s1444_s8  ;;  %v852_v54 = vld [vmem:[%s556_s16 + $0x8] sm:$0xff]  ;;  %s1467_s30 = sshll.u32 %s544_s13, 3 }
 0x1a7   : >> { %565 = vxpose.xlu0.c.b16.start.end [1/1] (short) %v557_v52, 128  ;;  %v550_v53 = vld [vmem:[%s549_s0] sm:$0xff]  ;;  %s541_s0 = sadd.s32 64, %s2068_s19  ;;  %s1244_s12 = scalar_lea.vmem [#allocation3], %s1467_s30 }
 0x1a8   : >> { %1520 = vmatprep.subr.bf16.mxu0 %v550_v53  ;;  %s558_s20 = sshra.s32 %s541_s0, 4  ;;  %s538_s18 = sadd.s32 1, %s1850_s18  }
 0x1a9   : >> { %1521 = vmatpush3.bf16.msra.mxu0 %v550_v53  ;;  %s1478_s29 = sshll.u32 %s558_s20, 4  ;;  %p535_p13 = scmp.ge.s32.totalorder %s538_s18, 2  }
 0x1aa   : >> { %1558 = vmatprep.subr.bf16.mxu0 %v550_v53  ;;  %s2191_s1 = scalar_lea.vmem [#allocation2], %s1478_s29  ;;  %vm1856_vm8 = vmmov (%p535_p13), 0   ;;  %vm1255_vm9 = vcmask (%p535_p13), 261120   ;;  %s1470_s16 = sshll.u32 (%p535_p13), %s1834_s25, 1 }
 0x1ab   : > { %s1312_s14 = sadd.s32 (%p535_p13), %s1830_s24, %s1470_s16  ;;  %s2304_s0 = scalar_lea.vmem (%p535_p13), [#allocation6], %s1968_s17 }
 0x1ac   : > { %s1471_s8 = sshll.u32 (%p535_p13), %s1312_s14, 7  ;;  %s1316_s20 = sshll.u32 (%p535_p13), %s2304_s0, 4  ;;  %s2233_s20 = int_to_ptr.vmem [resolvable:$true] %s1316_s20 }
 0x1ad   : > { %s2231_s30 = scalar_lea.hbm (%p535_p13), %s2294_s6, %s1471_s8  ;;  %s2305_s25 = smov (%p535_p13), %s2304_s0 }
 0x1ae   : > { %s2306_s24 = sand.u32 (%p535_p13), 1, %s1822_s22   ;;  %s1746_s19 = scalar_lea.vmem (%p535_p13), %s2233_s20, 128 }
 0x1af   : > { %p1747_p0 = scmp.ne.s32.totalorder (%p535_p13), %s2233_s20, %s1746_s19  ;;  %s1858_s13 = smov (%p535_p13), [#allocation6]  }
 0x1b0   : > { %s1750_s9 = sshll.u32 (%p535_p13), %s1858_s13, 4  ;;  %s1751_s9 = int_to_ptr.vmem [resolvable:$false] %s1750_s9 }
 0x1b1   : > { %p1748_p1 = pnand (%p535_p13), %p1747_p0, %p1945_p3  ;;  %s1752_s18 = scalar_lea.vmem (%p535_p13), %s1751_s9, 256 }
 0x1b2   : > { %p1753_p4 = scmp.lt.s32.totalorder (%p535_p13), %s2233_s20, %s1751_s9  ;;  %p1754_p5 = scmp.lt.s32.totalorder (%p535_p13), %s1752_s18, %s1746_s19 }
 0x1b3   : > { %p1749_p2 = pneg (%p535_p13), %p1748_p1 }
 0x1b4   : > { %p1755_p6 = por (%p535_p13), %p1754_p5, %p1753_p4 }
 0x1b6   : > { %p1756_p7 = pnand (%p535_p13), %p1755_p6, %p1749_p2 }
 0x1c4   : >> { %856 = vxpose.xlu0.c.b16.start.end [1/1] (short) %v852_v54, 128 }
 0x20d   : >> { %v573_v55 = vpop.trf.xlu0 }
 0x20e   : >> { %1522 = vmatprep.mubr.msk.bf16.mxu0 %vm581_vm6, %v573_v55 }
 0x211   : >> { %v574_v56 = vpop.trf.xlu0 }
 0x212   : >> { %1523 = vmatmul.mubr.msk.bf16.vlgmr.msra.gmra.mrb[0].mxu0 %vm581_vm6, %v574_v56 }
 0x213   : >> { %1559 = vmatpush3.bf16.msra.mxu0 %v550_v53 }
 0x215   : >> { %v575_v57 = vpop.trf.xlu0 }
 0x216   : >> { %1526 = vmatprep.mubr.msk.bf16.mxu0 %vm581_vm6, %v575_v57 }
 0x219   : >> { %v576_v58 = vpop.trf.xlu0 }
 0x21a   : >> { %1527 = vmatmul.mubr.msk.bf16.gmra.mrb[4].mxu0 %vm581_vm6, %v576_v58 }
 0x21d   : >> { %v577_v59 = vpop.trf.xlu0 }
 0x21e   : >> { %1530 = vmatprep.mubr.msk.bf16.mxu0 %vm581_vm6, %v577_v59 }
 0x221   : >> { %v578_v60 = vpop.trf.xlu0 }
 0x222   : >> { %1531 = vmatmul.mubr.msk.bf16.gmra.mrb[8].mxu0 %vm581_vm6, %v578_v60 }
 0x225   : >> { %v579_v61 = vpop.trf.xlu0 }
 0x226   : >> { %1534 = vmatprep.mubr.msk.bf16.mxu0 %vm581_vm6, %v579_v61 }
 0x229   : >> { %v580_v62 = vpop.trf.xlu0 }
 0x22a   : >> { %1535 = vmatmul.mubr.msk.bf16.gmra.mrb[12].mxu0 %vm581_vm6, %v580_v62 }
 0x22d   : >> { %v864_v63 = vpop.trf.xlu0 }
 0x22e   : >> { %1560 = vmatprep.mubr.msk.bf16.mxu0 %vm581_vm6, %v864_v63 }
 0x231   : >> { %v865_v0 = vpop.trf.xlu0 }
 0x232   : >> { %1561 = vmatmul.mubr.msk.bf16.vlgmr.msra.gmra.mrb[16].mxu0 %vm581_vm6, %v865_v0 }
 0x235   : >> { %v866_v14 = vpop.trf.xlu0 }
 0x236   : >> { %1564 = vmatprep.mubr.msk.bf16.mxu0 %vm581_vm6, %v866_v14 }
 0x239   : >> { %v867_v15 = vpop.trf.xlu0 }
 0x23a   : >> { %1565 = vmatmul.mubr.msk.bf16.gmra.mrb[20].mxu0 %vm581_vm6, %v867_v15 }
 0x23d   : >> { %v868_v17 = vpop.trf.xlu0 }
 0x23e   : >> { %1568 = vmatprep.mubr.msk.bf16.mxu0 %vm581_vm6, %v868_v17 }
 0x241   : >> { %v869_v18 = vpop.trf.xlu0 }
 0x242   : >> { %1569 = vmatmul.mubr.msk.bf16.gmra.mrb[24].mxu0 %vm581_vm6, %v869_v18 }
 0x245   : >> { %v870_v19 = vpop.trf.xlu0 }
 0x246   : >> { %1572 = vmatprep.mubr.msk.bf16.mxu0 %vm581_vm6, %v870_v19 }
 0x249   : >> { %v871_v24 = vpop.trf.xlu0 }
 0x24a   : >> { %1573 = vmatmul.mubr.msk.bf16.gmra.mrb[28].mxu0 %vm581_vm6, %v871_v24 }
 0x2e5   : >> { %v2093_v20 = vpop.f32.mrb[0].mxu0 }
 0x2e6   : >> { %v640_v21 = vpop.f32.mrb[1].mxu0 }
 0x2e7   : >> { %v2096_v22 = vpop.f32.mrb[2].mxu0 }
 0x2e8   : >> { %v643_v23 = vpop.f32.mrb[3].mxu0 }
 0x2ed   : >> { %v2099_v25 = vpop.f32.mrb[4].mxu0 }
 0x2ee   : >> { %v705_v26 = vmax.f32 %v2093_v20, %v2099_v25  ;;  %v656_v2 = vpop.f32.mrb[5].mxu0 }
 0x2ef   : >> { %v703_v3 = vmax.f32 %v640_v21, %v656_v2  ;;  %v2103_v8 = vpop.f32.mrb[6].mxu0 }
 0x2f0   : >> { %v706_v9 = vmax.f32 %v2096_v22, %v2103_v8  ;;  %v659_v4 = vpop.f32.mrb[7].mxu0 }
 0x2f1   : >> { %v704_v5 = vmax.f32 %v643_v23, %v659_v4 }
 0x2f5   : >> { %v2107_v27 = vpop.f32.mrb[8].mxu0 }
 0x2f6   : >> { %v709_v10 = vmax.f32 %v705_v26, %v2107_v27  ;;  %v2110_v11 = vpop.f32.mrb[9].mxu0 }
 0x2f7   : >> { %v707_v28 = vmax.f32 %v703_v3, %v2110_v11  ;;  %v2113_v29 = vpop.f32.mrb[10].mxu0 }
 0x2f8   : >> { %v710_v30 = vmax.f32 %v706_v9, %v2113_v29  ;;  %v2116_v31 = vpop.f32.mrb[11].mxu0 }
 0x2f9   : >> { %v708_v16 = vmax.f32 %v704_v5, %v2116_v31 }
 0x2fd   : >> { %v2119_v6 = vpop.f32.mrb[12].mxu0 }
 0x2fe   : >> { %v713_v7 = vmax.f32 %v709_v10, %v2119_v6  ;;  %v2122_v12 = vpop.f32.mrb[13].mxu0 }
 0x2ff   : >> { %v711_v13 = vmax.f32 %v707_v28, %v2122_v12  ;;  %v2125_v32 = vpop.f32.mrb[14].mxu0 }
 0x300   : >> { %v714_v33 = vmax.f32 %v710_v30, %v2125_v32  ;;  %v691_v34 = vpop.f32.mrb[15].mxu0 }
 0x301   : >> { %v712_v35 = vmax.f32 %v708_v16, %v691_v34 }
 0x302   : >> { %v716_v36 = vmax.f32 %v713_v7, %v714_v33 }
 0x303   : >> { %v715_v37 = vmax.f32 %v711_v13, %v712_v35 }
 0x305   : >> { %v717_v38 = vmax.f32 %v715_v37, %v716_v36  ;;  %v1562_v39 = vpop.f32.mrb[16].mxu0 }
 0x306   : >> { %v2128_v40 = vpop.f32.mrb[17].mxu0 }
 0x307   : >> { %v718_v41 = vrot.slane %v717_v38, 4  ;;  %v1090_v42 = vmax.f32 %v2128_v40, -1e+30  ;;  %v1563_v43 = vpop.f32.mrb[18].mxu0 }
 0x308   : >> { %v933_v44 = vpop.f32.mrb[19].mxu0 }
 0x309   : >> { %v719_v45 = vmax.f32 %v717_v38, %v718_v41  ;;  %v1094_v46 = vmax.f32 %v1090_v42, -1e+30  ;;  %v1091_v47 = vmax.f32 %v933_v44, -1e+30 }
 0x30b   : >> { %v720_v48 = vrot.slane %v719_v45, 2  ;;  %v1098_v49 = vmax.f32 %v1094_v46, -1e+30  ;;  %v1095_v50 = vmax.f32 %v1091_v47, -1e+30 }
 0x30d   : >> { %v721_v51 = vmax.f32 %v719_v45, %v720_v48  ;;  %v1099_v52 = vmax.f32 %v1095_v50, -1e+30 }
 0x30f   : >> { %v722_v53 = vrot.slane %v721_v51, 1  ;;  %v1102_v54 = vmax.f32 %v1098_v49, %v1099_v52 }
 0x311   : >> { %v723_v55 = vmax.f32 %v721_v51, %v722_v53  ;;  %v1104_v56 = vmax.f32 %v1102_v54, -1e+30 }
 0x313   : >> { %v2131_v57 = vmax.f32 %v723_v55, -1e+30  ;;  %v1105_v58 = vrot.slane %v1104_v56, 4 }
 0x315   : >> { %v741_v59 = vsub.f32 %v691_v34, %v2131_v57  ;;  %v1106_v60 = vmax.f32 %v1104_v56, %v1105_v58  ;;  %v728_v61 = vsub.f32 %v640_v21, %v2131_v57  ;;  %v729_v62 = vsub.f32 %v643_v23, %v2131_v57 }
 0x316   : >> { %v730_v63 = vsub.f32 %v2093_v20, %v2131_v57  ;;  %v731_v0 = vsub.f32 %v2096_v22, %v2131_v57  ;;  %v732_v14 = vsub.f32 %v656_v2, %v2131_v57  ;;  %v733_v15 = vsub.f32 %v659_v4, %v2131_v57 }
 0x317   : >> { %v1107_v17 = vrot.slane %v1106_v60, 2  ;;  %v744_v18 = vmul.f32 1.442695, %v728_v61  ;;  %v734_v19 = vsub.f32 %v2099_v25, %v2131_v57  ;;  %v746_v24 = vmul.f32 1.442695, %v729_v62 }
 0x318   : >> { %v748_v26 = vmul.f32 1.442695, %v730_v63  ;;  %v735_v21 = vsub.f32 %v2103_v8, %v2131_v57  ;;  %v750_v3 = vmul.f32 1.442695, %v731_v0  ;;  %v752_v20 = vmul.f32 1.442695, %v732_v14 }
 0x319   : >> { %v1108_v23 = vmax.f32 %v1106_v60, %v1107_v17  ;;  %1701 = vpow2.f32 %v744_v18  ;;  %v754_v9 = vmul.f32 1.442695, %v733_v15  ;;  %v736_v22 = vsub.f32 %v2110_v11, %v2131_v57 }
 0x31a   : >> { %1703 = vpow2.f32 %v746_v24  ;;  %v737_v4 = vsub.f32 %v2116_v31, %v2131_v57  ;;  %v738_v25 = vsub.f32 %v2107_v27, %v2131_v57  ;;  %v756_v5 = vmul.f32 1.442695, %v734_v19 }
 0x31b   : >> { %v1109_v2 = vrot.slane %v1108_v23, 1  ;;  %1705 = vpow2.f32 %v748_v26  ;;  %v739_v8 = vsub.f32 %v2113_v29, %v2131_v57  ;;  %v740_v10 = vsub.f32 %v2122_v12, %v2131_v57 }
 0x31c   : >> { %1707 = vpow2.f32 %v750_v3  ;;  %v758_v11 = vmul.f32 1.442695, %v735_v21  ;;  %v742_v30 = vsub.f32 %v2119_v6, %v2131_v57  ;;  %v760_v27 = vmul.f32 1.442695, %v736_v22 }
 0x31d   : >> { %v1110_v28 = vmax.f32 %v1108_v23, %v1109_v2  ;;  %1709 = vpow2.f32 %v752_v20  ;;  %v743_v16 = vsub.f32 %v2125_v32, %v2131_v57  ;;  %v770_v7 = vmul.f32 1.442695, %v741_v59 }
 0x31e   : >> { %1711 = vpow2.f32 %v754_v9  ;;  %v762_v29 = vmul.f32 1.442695, %v737_v4  ;;  %v764_v38 = vmul.f32 1.442695, %v738_v25  ;;  %v766_v43 = vmul.f32 1.442695, %v739_v8 }
 0x31f   : >> { %v2159_v31 = vmax.f32 %v2131_v57, %v1110_v28  ;;  %1713 = vpow2.f32 %v756_v5  ;;  %v772_v48 = vmul.f32 1.442695, %v742_v30  ;;  %v774_v50 = vmul.f32 1.442695, %v743_v16 }
 0x320   : >> { %1715 = vpow2.f32 %v758_v11  ;;  %v725_v28 = vsub.f32 -1e+30, %v2131_v57 }
 0x321   : >> { %v1112_v12 = vsub.f32 %v2131_v57, %v2159_v31  ;;  %v1115_v13 = vsub.f32 %v2128_v40, %v2159_v31  ;;  %v1116_v33 = vsub.f32 %v933_v44, %v2159_v31  ;;  %v1117_v6 = vsub.f32 -1e+30, %v2159_v31 }
 0x322   : >> { %1717 = vpow2.f32 %v760_v27  ;;  %v768_v44 = vmul.f32 1.442695, %v740_v10 }
 0x323   : >> { %v1131_v34 = vmul.f32 1.442695, %v1115_v13  ;;  %v1133_v35 = vmul.f32 1.442695, %v1116_v33  ;;  %v1702_v36 = vpop.eup %1701  ;;  %v1135_v37 = vmul.f32 1.442695, %v1117_v6  ;;  %1719 = vpow2.f32 %v762_v29 }
 0x324   : >> { %v1704_v32 = vpop.eup %1703  ;;  %1721 = vpow2.f32 %v770_v7  ;;  %v726_v7 = vmul.f32 1.442695, %v725_v28 }
 0x325   : >> { %v1706_v39 = vpop.eup %1705  ;;  %1723 = vpow2.f32 %v1131_v34  ;;  %v776_v41 = vadd.f32 %v1704_v32, %v1702_v36  ;;  %v797_v42 = vpack.c.bf16 %v1704_v32, %v1702_v36  ;;  %v1113_v36 = vmul.f32 1.442695, %v1112_v12 }
 0x326   : >> { %v1708_v40 = vpop.eup %1707  ;;  %1725 = vpow2.f32 %v1133_v35 }
 0x327   : >> { %v1710_v45 = vpop.eup %1709  ;;  %1727 = vpow2.f32 %v1135_v37  ;;  %1539 = vmatpush3.bf16.msra.mxu1 %v797_v42  ;;  %v777_v46 = vadd.f32 %v1706_v39, %v776_v41  ;;  %v798_v47 = vpack.c.bf16 %v1708_v40, %v1706_v39  ;;  %v564_v37 = vld [vmem:[%s2191_s1] sm:$0xff] }
 0x328   : >> { %v1712_v49 = vpop.eup %1711  ;;  %1540 = vmatprep.subr.bf16.mxu1 %v1853_v1  ;;  %1729 = vpow2.f32 %v764_v38 }
 0x329   : >> { %v1714_v51 = vpop.eup %1713  ;;  %v778_v52 = vadd.f32 %v1708_v40, %v777_v46  ;;  %v799_v53 = vpack.c.bf16 %v1712_v49, %v1710_v45  ;;  %1731 = vpow2.f32 %v766_v43 }
 0x32a   : >> { %1733 = vpow2.f32 %v768_v44  ;;  %v1716_v54 = vpop.eup %1715 }
 0x32b   : >> { %1541 = vmatpush3.bf16.msra.mxu1 %v798_v47  ;;  %v779_v55 = vadd.f32 %v1710_v45, %v778_v52  ;;  %1735 = vpow2.f32 %v772_v48  ;;  %v800_v58 = vpack.c.bf16 %v1716_v54, %v1714_v51 }
 0x32c   : >> { %v1718_v56 = vpop.eup %1717  ;;  %1542 = vmatprep.subr.bf16.mxu1 %v1853_v1  ;;  %1737 = vpow2.f32 %v774_v50 }
 0x32d   : >> { %v1720_v59 = vpop.eup %1719  ;;  %v780_v60 = vadd.f32 %v1712_v49, %v779_v55  ;;  %1739 = vpow2.f32 %v726_v7 }
 0x32e   : >> { %v1722_v61 = vpop.eup %1721  ;;  %v801_v62 = vpack.c.bf16 %v1720_v59, %v1718_v56  ;;  %1741 = vpow2.f32 %v1113_v36 }
 0x32f   : >> { %v1724_v63 = vpop.eup %1723  ;;  %1543 = vmatpush3.bf16.msra.mxu1 %v799_v53  ;;  %v781_v0 = vadd.f32 %v1714_v51, %v780_v60  ;;  %v855_v60 = vld [vmem:[%s2191_s1 + $0x8] sm:$0xff] }
 0x330   : >> { %v1726_v14 = vpop.eup %1725  ;;  %1544 = vmatprep.subr.bf16.mxu1 %v1853_v1 }
 0x331   : >> { %v2172_v15 = vpop.eup %1727  ;;  %v1163_v17 = vadd.f32 %v1726_v14, %v1724_v63  ;;  %v782_v18 = vadd.f32 %v1716_v54, %v781_v0  ;;  %v1184_v19 = vpack.c.bf16 %v1726_v14, %v1724_v63 }
 0x332   : >> { %v1730_v24 = vpop.eup %1729  ;;  %v1185_v12 = vpack.c.bf16 %v2172_v15, %v2172_v15 }
 0x333   : >> { %v1732_v26 = vpop.eup %1731  ;;  %v1164_v21 = vadd.f32 %v2172_v15, %v1163_v17  ;;  %1545 = vmatpush3.bf16.msra.mxu1 %v800_v58  ;;  %v783_v23 = vadd.f32 %v1718_v56, %v782_v18 }
 0x334   : >> { %v1734_v3 = vpop.eup %1733  ;;  %1546 = vmatprep.subr.bf16.mxu1 %v1853_v1  ;;  %v802_v20 = vpack.c.bf16 %v1732_v26, %v1730_v24 }
 0x335   : >> { %v1736_v9 = vpop.eup %1735  ;;  %v1165_v22 = vadd.f32 %v2172_v15, %v1164_v21  ;;  %v784_v2 = vadd.f32 %v1720_v59, %v783_v23  ;;  %v803_v4 = vpack.c.bf16 %v1722_v61, %v1734_v3 }
 0x336   : >> { %v1738_v25 = vpop.eup %1737 }
 0x337   : >> { %v1166_v5 = vadd.f32 %v2172_v15, %v1165_v22  ;;  %1547 = vmatpush3.bf16.msra.mxu1 %v801_v62  ;;  %v785_v8 = vadd.f32 %v1730_v24, %v784_v2  ;;  %v804_v10 = vpack.c.bf16 %v1738_v25, %v1736_v9  ;;  %v1740_v40 = vpop.eup %1739 }
 0x338   : >> { %1548 = vmatprep.subr.bf16.mxu1 %v1853_v1  ;;  %v805_v47 = vmul.f32 0.0, %v1740_v40  ;;  %v1742_v51 = vpop.eup %1741 }
 0x339   : >> { %v1167_v11 = vadd.f32 %v2172_v15, %v1166_v5  ;;  %v786_v30 = vadd.f32 %v1732_v26, %v785_v8 }
 0x33b   : >> { %v1168_v27 = vadd.f32 %v2172_v15, %v1167_v11  ;;  %1549 = vmatpush3.bf16.msra.mxu1 %v802_v20  ;;  %v787_v16 = vadd.f32 %v1734_v3, %v786_v30 }
 0x33c   : >> { %1550 = vmatprep.subr.bf16.mxu1 %v1853_v1 }
 0x33d   : >> { %v1169_v29 = vadd.f32 %v2172_v15, %v1168_v27  ;;  %v788_v13 = vadd.f32 %v1722_v61, %v787_v16  ;;  %v1566_v61 = vpop.f32.mrb[20].mxu0 }
 0x33e   : >> { %v946_v62 = vpop.f32.mrb[21].mxu0 }
 0x33f   : >> { %v1170_v33 = vadd.f32 %v2172_v15, %v1169_v29  ;;  %1551 = vmatpush3.bf16.msra.mxu1 %v803_v4  ;;  %v789_v6 = vadd.f32 %v1736_v9, %v788_v13  ;;  %v1567_v63 = vpop.f32.mrb[22].mxu0  ;;  %v1855_v13 = vmov (%p535_p13), 0.0  }
 0x340   : >> { %1552 = vmatprep.subr.bf16.mxu1 %v1853_v1  ;;  %v949_v0 = vpop.f32.mrb[23].mxu0  ;;  %1596 = vmatprep.subr.bf16.mxu0 (%p535_p13), %v1855_v13 }
 0x341   : >> { %v1171_v34 = vadd.f32 %v2172_v15, %v1170_v33  ;;  %v790_v35 = vadd.f32 %v1738_v25, %v789_v6  ;;  %v1570_v14 = vpop.f32.mrb[24].mxu0  ;;  %1600 = vmatprep.mubr.msk.bf16.mxu0 (%p535_p13), %vm1856_vm8, %v1855_v13  ;;  %v1249_v33 = vld [vmem:[%s2293_s5] sm:$0xff] (%p535_p13)  ;;  %v1857_v6 = vmov (%p535_p13), 0  }
 0x342   : > { %1745 = vset.pattern.permute.xlu0 (%p535_p13), %v1857_v6 }
 0x343   : >> { %1553 = vmatpush3.bf16.msra.mxu1 %v804_v10  ;;  %v791_v32 = vrot.slane %v790_v35, 4  ;;  %v1172_v38 = vadd.f32 %v2172_v15, %v1171_v34  ;;  %1252 = vperm.xlu0 (%p535_p13), %1745, %v1249_v33  }
 0x344   : >> { %1576 = vmatprep.subr.bf16.mxu1 %v1853_v1 }
 0x345   : >> { %v792_v39 = vadd.f32 %v791_v32, %v790_v35  ;;  %v1173_v41 = vadd.f32 %v2172_v15, %v1172_v38  ;;  %v1246_v35 = vld [vmem:[%s2292_s4] sm:$0xf] (%p535_p13) }
 0x346   : >> { %1555 = vmatmul.mubr.bf16.vlgmr.msra.gmra.mrb[0].mxu1 %v564_v37 }
 0x347   : >> { %1577 = vmatpush3.bf16.msra.mxu1 %v1184_v19  ;;  %1592 = vmatprep.mubr.msk.bf16.mxu1 %vm1854_vm7, %v1853_v1  ;;  %v793_v57 = vrot.slane %v792_v39, 2  ;;  %v1174_v31 = vadd.f32 %v2172_v15, %v1173_v41 }
 0x348   : >> { %1578 = vmatprep.subr.bf16.mxu1 %v1853_v1 }
 0x349   : >> { %v794_v42 = vadd.f32 %v793_v57, %v792_v39  ;;  %v1175_v43 = vadd.f32 %v2172_v15, %v1174_v31 }
 0x34b   : >> { %1579 = vmatpush3.bf16.msra.mxu1 %v1185_v12  ;;  %v795_v44 = vrot.slane %v794_v42, 1  ;;  %v1176_v45 = vadd.f32 %v2172_v15, %v1175_v43 }
 0x34c   : >> { %1580 = vmatprep.subr.bf16.mxu1 %v1853_v1 }
 0x34d   : >> { %v796_v46 = vadd.f32 %v795_v44, %v794_v42  ;;  %v1177_v48 = vadd.f32 %v2172_v15, %v1176_v45  ;;  %v962_v15 = vpop.f32.mrb[25].mxu0 }
 0x34e   : >> { %v1571_v17 = vpop.f32.mrb[26].mxu0 }
 0x34f   : >> { %1581 = vmatpush3.bf16.msra.mxu1 %v1185_v12  ;;  %v806_v49 = vadd.f32 %v805_v47, %v796_v46  ;;  %v1178_v50 = vrot.slane %v1177_v48, 4  ;;  %v965_v18 = vpop.f32.mrb[27].mxu0 }
 0x350   : >> { %1582 = vmatprep.subr.bf16.mxu1 %v1853_v1  ;;  %v1574_v19 = vpop.f32.mrb[28].mxu0 }
 0x351   : >> { %v1179_v52 = vadd.f32 %v1178_v50, %v1177_v48  ;;  %v1192_v53 = vmul.f32 %v1742_v51, %v806_v49  ;;  %v978_v24 = vpop.f32.mrb[29].mxu0 }
 0x352   : >> { %v1575_v26 = vpop.f32.mrb[30].mxu0 }
 0x353   : >> { %1583 = vmatpush3.bf16.msra.mxu1 %v1185_v12  ;;  %v1180_v54 = vrot.slane %v1179_v52, 2  ;;  %v981_v21 = vpop.f32.mrb[31].mxu0 }
 0x354   : >> { %1584 = vmatprep.subr.bf16.mxu1 %v1853_v1 }
 0x355   : >> { %v1181_v55 = vadd.f32 %v1180_v54, %v1179_v52 }
 0x357   : >> { %1585 = vmatpush3.bf16.msra.mxu1 %v1185_v12  ;;  %v1182_v56 = vrot.slane %v1181_v55, 1 }
 0x358   : >> { %1586 = vmatprep.subr.bf16.mxu1 %v1853_v1 }
 0x359   : >> { %v1183_v58 = vadd.f32 %v1182_v56, %v1181_v55 }
 0x35b   : >> { %1587 = vmatpush3.bf16.msra.mxu1 %v1185_v12  ;;  %v1193_v59 = vadd.f32 %v1192_v53, %v1183_v58 }
 0x35c   : >> { %1588 = vmatprep.subr.bf16.mxu1 %v1853_v1 }
 0x35d   : >> { %1743 = vrcp.f32 %v1193_v59 }
 0x35f   : >> { %1589 = vmatpush3.bf16.msra.mxu1 %v1185_v12 }
 0x360   : >> { %1590 = vmatprep.subr.bf16.mxu1 %v1853_v1 }
 0x363   : >> { %1591 = vmatpush3.bf16.msra.mxu1 %v1185_v12 }
 0x366   : >> { %1593 = vmatmul.mubr.bf16.vlgmr.msra.gmra.mrb[4].mxu1 %v855_v60 }
 0x367   : >> { %v1744_v10 = vpop.eup %1743 }
 0x3c2   : > { %v1253_v36 = vpop.permute.xlu0 (%p535_p13), %1252 }
 0x419   : >> { %v841_v23 = vpop.f32.mrb[0].mxu1 }
 0x41a   : >> { %v848_v3 = vadd.f32 %v841_v23, %v805_v47  ;;  %v1556_v20 = vpop.f32.mrb[1].mxu1 }
 0x41b   : >> { %v844_v1 = vpop.f32.mrb[2].mxu1 }
 0x41c   : >> { %v849_v9 = vadd.f32 %v844_v1, %v805_v47  ;;  %v1557_v22 = vpop.f32.mrb[3].mxu1  ;;  %v1194_v2 = vmul.f32 %v1742_v51, %v848_v3 }
 0x41e   : >> { %v1195_v4 = vmul.f32 %v1742_v51, %v849_v9 }
 0x439   : >> { %v1230_v25 = vpop.f32.mrb[4].mxu1 }
 0x43a   : >> { %v1237_v5 = vadd.f32 %v1230_v25, %v1194_v2  ;;  %v1594_v8 = vpop.f32.mrb[5].mxu1 }
 0x43b   : >> { %v1233_v28 = vpop.f32.mrb[6].mxu1 }
 0x43c   : >> { %v1240_v11 = vmul.f32 %v1744_v10, %v1237_v5  ;;  %v1238_v30 = vadd.f32 %v1233_v28, %v1195_v4  ;;  %v1595_v27 = vpop.f32.mrb[7].mxu1  ;;  %537 = sbr.rel (!%p535_p13) target bundleno = 417 (0x1a1), region = 133 }
 0x43e   : >> { %v1241_v16 = vmul.f32 %v1744_v10, %v1238_v30 }
 0x440   : >> { %v1242_v7 = vpack.c.bf16 %v1241_v16, %v1240_v11 }
 0x442   : >> { %1245 = vst [vmem:[%s1244_s12] sm:$0xff] %v1242_v7  ;;  %s1301_s12 = scalar_lea.sflag (%p535_p13), [#allocation7], %s2306_s24 }
 0x449   : > { %v1247_v29 = vld [vmem:[#allocation3] sm:$0xff]  ;;  %v1248_v34 = vld [vmem:[#allocation3 + $0x8] sm:$0xff] }
 0x44a   : > { %1597 = vmatpush3.bf16.msra.mxu0 %v1247_v29 }
 0x44b   : > { %1598 = vmatprep.subr.bf16.mxu0 %v1855_v13 }
 0x44e   : > { %1599 = vmatpush3.bf16.msra.mxu0 %v1248_v34 }
 0x451   : > { %1601 = vmatmul.mubr.msk.bf16.vlgmr.msra.gmra.mrb[0].mxu0 %vm1255_vm9, %v1246_v35 }
 0x524   : > { %v1293_v37 = vpop.f32.mrb[0].mxu0 }
 0x525   : > { %v1294_v32 = vadd.f32 %v1293_v37, %v1253_v36  ;;  %v1602_v38 = vpop.f32.mrb[1].mxu0 }
 0x526   : > { %v1296_v39 = vpop.f32.mrb[2].mxu0 }
 0x527   : > { %1299 = vst [vmem:[%s2305_s25] sm:$0xff] %v1294_v32  ;;  %v1603_v41 = vpop.f32.mrb[3].mxu0 }
 0x528   : > { %1759 = shalt.err (!%p1756_p7)
}
 0x529   : > { %s1760_s17 = scalar_lea.hbm %s2231_s30, 128  ;;  %s1764_s8 = scalar_lea.hbm %s2294_s6, 512 }
 0x52a   : > { %p1761_p9 = scmp.ne.s32.totalorder %s2231_s30, %s1760_s17  ;;  %p1765_p12 = scmp.lt.u32.totalorder %s2231_s30, %s2294_s6 }
 0x52b   : > { %p1766_p13 = scmp.lt.u32.totalorder %s1764_s8, %s1760_s17  ;;  %p1768_p1 = scmp.lt.u32.totalorder %s1760_s17, %s2231_s30 }
 0x52c   : > { %p1762_p10 = pnand %p1761_p9, %p1945_p3 }
 0x52d   : > { %p1767_p0 = por %p1766_p13, %p1765_p12 }
 0x52e   : > { %p1763_p11 = pneg %p1762_p10 }
 0x52f   : > { %p1769_p2 = por %p1768_p1, %p1767_p0 }
 0x531   : > { %p1770_p4 = pnand %p1769_p2, %p1763_p11 }
 0x533   : > { %1773 = shalt.err (!%p1770_p4)
}
 0x534   : > { %1606 = dma.vmem_to_hbm [thread:$0]  (%p1945_p3), %s2233_s20, 128, %s2231_s30, %s1301_s12  }
 0x535 PF: > { %p1612_p5 = scmp.ge.s32.totalorder %s1846_s28, 2  ;;  %s1328_s1 = sand.u32 1, %s1818_s21  }
 0x536   : > { %s1329_s25 = scalar_lea.sflag [#allocation7], %s1328_s1 }
 0x537   : > { %p1609_p6 = pnand %p1612_p5, %p1954_p8 }
 0x539   : > { %1813 = dma.done.wait (!%p1609_p6), %s1329_s25, 128  }
 0x53a   : > { %1815 = vsyncadd (!%p1609_p6), %s1329_s25, 4294967168  ;;  %s19_s28 = sadd.s32 1, %s1846_s28   ;;  %s2307_s10 = sld [smem:[#allocation11_spill]] }
 0x53b   : > { %p16_p7 = scmp.ge.s32.totalorder %s19_s28, 6   ;;  %s2308_s21 = smov %s1822_s22 }
 0x53c   : > { %s2309_s22 = smov %s1826_s23  ;;  %s2310_s23 = smov %s1963_s15 }
 0x53d   : > { %s2311_s24 = smov %s1838_s26  ;;  %s2312_s25 = smov %s1842_s27 }
 0x53e   : > { %s2313_s26 = smov %s2316_s7  ;;  %18 = sbr.rel (!%p16_p7) target bundleno = 8 (0x8), region = 144 }
 0x540   : > { %s2314_s27 = smov %s2307_s10 }
 0x545   :  { %1334 = vsyncpa [#allocation7], 1 }
 0x546   :  { %1336 = vsyncpa [#allocation7 + $0x1], 1 }
 0x547   :  { %1337 = vsyncmov [#allocation5] }
 0x54a   :  { %s1338_s11 = vpop.sfrf %1337 }
 0x54b   :  { %p1474_p3 = scmp.ne.s32.totalorder %s1338_s11, 0 }
 0x54d   :  { %1342 = shalt.err (%p1474_p3)  }
 0x54e   :  { %1344 = vsyncmov [#allocation5 + $0x1] }
 0x551   :  { %s1345_s20 = vpop.sfrf %1344 }
 0x552   :  { %p1475_p8 = scmp.ne.s32.totalorder %s1345_s20, 0 }
 0x554   :  { %1349 = shalt.err (%p1475_p8)  }

</bundles_post_ra>
